<compile_context>
chip_gen: v6e
topology: v6e:2x2x1
jax: 0.10.0
libtpu: 0.0.40
codegen_flags: <defaults>
</compile_context>

<pallas_src>
import math

import jax
import jax.numpy as jnp
from jax.experimental import pallas as pl
from jax.experimental.pallas import tpu as pltpu

_LANE = 128
_SUBLANE = 8


def _cdiv(a, b):
    return (a + b - 1) // b


def _ru(x, m):
    return _cdiv(x, m) * m


def _time_encode_kernel(t_ref, f_ref, ph_ref, w1_ref, b1_ref, w2_ref, b2_ref, o_ref):
    # t_ref  : (TB, 1)                 time steps (padded batch tile)
    # f_ref  : (1, dim_in)             [freqs, freqs]
    # ph_ref : (1, dim_in)             [0...0, pi/2...pi/2]
    # w1_ref : (dim_in, hidden)        first Linear weight (transposed)
    # b1_ref : (1, hidden)
    # w2_ref : (hidden, channel_time)  second Linear weight (transposed)
    # b2_ref : (1, channel_time)
    # o_ref  : (TB, channel_time)
    #
    # cat(sin(a), cos(a)) == sin(t*[f, f] + [0, pi/2])  -> single EUP call,
    # single first-layer matmul.
    ang = t_ref[...] * f_ref[...] + ph_ref[...]                      # (TB, dim_in)
    emb = jnp.sin(ang)

    h = jnp.dot(emb, w1_ref[...], preferred_element_type=jnp.float32) + b1_ref[...]
    h = jnp.where(h >= 0.0, h, 0.2 * h)                              # LeakyReLU(0.2)

    y = jnp.dot(h, w2_ref[...], preferred_element_type=jnp.float32) + b2_ref[...]
    o_ref[...] = y.astype(o_ref.dtype)


def _padded_tile_bytes(rows, cols, itemsize=4):
    return _ru(max(rows, 1), _SUBLANE) * _ru(max(cols, 1), _LANE) * itemsize


def _pick_tiling(bs, dim_in, hidden, channel_time, block_bs, out_itemsize,
                 vmem_target_bytes):
    """Balanced batch tiling: #tiles first, then tile size; >=2 tiles when possible."""
    bs8 = max(_SUBLANE, _ru(bs, _SUBLANE))

    # Per-batch-row VMEM cost inside one grid step (lane-padded, double-buffered
    # where Pallas double-buffers):  (tb,1) t block pads to 128 lanes.
    row_bytes = (
        2 * _LANE * 4                                    # t tile (x2 buffers)
        + 2 * _ru(channel_time, _LANE) * out_itemsize    # output tile (x2 buffers)
        + 4 * (_ru(dim_in, _LANE) + _ru(hidden, _LANE) + _ru(channel_time, _LANE))
    )
    # Constant operands (worst case: double buffered).
    weight_bytes = 2 * (2 * _padded_tile_bytes(1, dim_in)
                        + _padded_tile_bytes(dim_in, hidden)
                        + _padded_tile_bytes(1, hidden)
                        + _padded_tile_bytes(hidden, channel_time)
                        + _padded_tile_bytes(1, channel_time))

    budget = max(vmem_target_bytes - weight_bytes, 4 * 1024 * 1024)
    max_tb = max(_SUBLANE, (budget // row_bytes) // _SUBLANE * _SUBLANE)
    tb_cap = max(_SUBLANE, min(block_bs, max_tb))

    n_tiles = max(1, _cdiv(bs8, tb_cap))
    if n_tiles == 1 and bs8 >= 2 * _SUBLANE:
        n_tiles = 2                      # keep both v7x TensorCores busy
    tb = _ru(_cdiv(bs8, n_tiles), _SUBLANE)
    n_tiles = _cdiv(bs8, tb)
    bs_pad = tb * n_tiles
    return tb, n_tiles, bs_pad


def time_encode_forward(t, w1, b1, w2, b2, theta=10000.0, block_bs=2048,
                        out_dtype=jnp.float32):
    """TimeEncode forward.

    t : [bs]                time steps
    w1: [ct//2, ct//4]      first Linear weight (PyTorch layout)
    b1: [ct//2]
    w2: [ct, ct//2]         second Linear weight (PyTorch layout)
    b2: [ct]
    returns: [bs, ct]  (out_dtype; default f32 to match the PyTorch module)
    """
    bs = t.shape[0]
    hidden, dim_in = w1.shape            # ct//2, ct//4
    channel_time = w2.shape[0]           # ct
    half_dim = dim_in // 2               # NOTE: half_dim == 1 divides by zero,
                                         # exactly like the PyTorch reference.

    # --- parameter-sized preprocessing (tiny; once per call) ------------------
    freqs = jnp.exp(
        jnp.arange(half_dim, dtype=jnp.float32) * (-math.log(theta) / (half_dim - 1))
    )
    freqs_ext = jnp.concatenate([freqs, freqs]).reshape(1, dim_in)
    phase = jnp.concatenate(
        [jnp.zeros((half_dim,), jnp.float32),
         jnp.full((half_dim,), 0.5 * math.pi, jnp.float32)]
    ).reshape(1, dim_in)

    w1_t = jnp.transpose(w1, (1, 0))     # (dim_in, hidden)
    w2_t = jnp.transpose(w2, (1, 0))     # (hidden, channel_time)
    b1_2 = b1.reshape(1, hidden).astype(jnp.float32)
    b2_2 = b2.reshape(1, channel_time).astype(jnp.float32)

    out_itemsize = jnp.dtype(out_dtype).itemsize
    vmem_limit = 48 * 1024 * 1024        # < v7x 64 MiB physical; >> scoped defaults
    tb, n_tiles, bs_pad = _pick_tiling(bs, dim_in, hidden, channel_time, block_bs,
                                       out_itemsize, vmem_target_bytes=32 * 1024 * 1024)

    t_f = t.astype(jnp.float32).reshape(bs, 1)
    if bs_pad != bs:
        t_f = jnp.pad(t_f, ((0, bs_pad - bs), (0, 0)))

    cost = pl.CostEstimate(
        flops=2 * bs_pad * (dim_in * hidden + hidden * channel_time),
        transcendentals=bs_pad * dim_in,
        bytes_accessed=(4 * bs_pad
                        + out_itemsize * bs_pad * channel_time
                        + 4 * (2 * dim_in + dim_in * hidden + hidden
                               + hidden * channel_time + channel_time)),
    )

    def _run(single_buffer_consts):
        def const_spec(shape):
            kwargs = {}
            if single_buffer_consts:
                # Constant index_map => double buffering is pure VMEM waste.
                kwargs["pipeline_mode"] = pl.Buffered(1)
            return pl.BlockSpec(shape, lambda i: (0, 0), **kwargs)

        return pl.pallas_call(
            _time_encode_kernel,
            out_shape=jax.ShapeDtypeStruct((bs_pad, channel_time), out_dtype),
            grid_spec=pltpu.PrefetchScalarGridSpec(
                num_scalar_prefetch=0,
                grid=(n_tiles,),
                in_specs=[
                    pl.BlockSpec((tb, 1), lambda i: (i, 0)),
                    const_spec((1, dim_in)),
                    const_spec((1, dim_in)),
                    const_spec((dim_in, hidden)),
                    const_spec((1, hidden)),
                    const_spec((hidden, channel_time)),
                    const_spec((1, channel_time)),
                ],
                out_specs=pl.BlockSpec((tb, channel_time), lambda i: (i, 0)),
            ),
            compiler_params=pltpu.CompilerParams(
                dimension_semantics=("parallel",),
                vmem_limit_bytes=vmem_limit,
            ),
            cost_estimate=cost,
        )(t_f, freqs_ext, phase, w1_t, b1_2, w2_t, b2_2)

    try:
        out = _run(True)
    except Exception:
        # pl.Buffered(1) / pipeline_mode not supported by this jax version:
        # identical kernel, default (double) buffering of the constants.
        out = _run(False)

    return out if bs_pad == bs else out[:bs]


def time_encode_reference(t, w1, b1, w2, b2, theta=10000.0):
    """Pure-JAX reference mirroring the PyTorch forward exactly."""
    dim_in = w1.shape[1]
    half_dim = dim_in // 2
    freqs = jnp.exp(jnp.arange(half_dim, dtype=jnp.float32)
                    * (-math.log(theta) / (half_dim - 1)))
    ang = t.astype(jnp.float32)[:, None] * freqs[None, :]
    emb = jnp.concatenate([jnp.sin(ang), jnp.cos(ang)], axis=-1)
    h = emb @ w1.T + b1
    h = jnp.where(h >= 0.0, h, 0.2 * h)
    return h @ w2.T + b2


if __name__ == "__main__":
    key = jax.random.PRNGKey(0)
    bs, channel_time = 8, 32
    dim_in = channel_time // 4          # 8  (SinusoidalPosEmb dim)
    hidden = channel_time // 2          # 16

    k_t, k_w1, k_b1, k_w2, k_b2 = jax.random.split(key, 5)
    t = jax.random.uniform(k_t, (bs,), jnp.float32, 0.0, 1000.0)   # diffusion-style steps

    # deterministic parameter init (nn.Linear default bounds)
    bound1 = 1.0 / math.sqrt(dim_in)
    w1 = jax.random.uniform(k_w1, (hidden, dim_in), jnp.float32, -bound1, bound1)
    b1 = jax.random.uniform(k_b1, (hidden,), jnp.float32, -bound1, bound1)
    bound2 = 1.0 / math.sqrt(hidden)
    w2 = jax.random.uniform(k_w2, (channel_time, hidden), jnp.float32, -bound2, bound2)
    b2 = jax.random.uniform(k_b2, (channel_time,), jnp.float32, -bound2, bound2)

    out = jax.block_until_ready(time_encode_forward(t, w1, b1, w2, b2))
    ref = time_encode_reference(t, w1, b1, w2, b2)
    assert out.shape == (bs, channel_time)
    assert jnp.allclose(out, ref, atol=2e-3, rtol=2e-3)

    # padded / non-multiple-of-8 batch path
    t2 = jax.random.uniform(jax.random.PRNGKey(1), (5,), jnp.float32, 0.0, 1000.0)
    out2 = jax.block_until_ready(time_encode_forward(t2, w1, b1, w2, b2))
    assert out2.shape == (5, channel_time)
    assert jnp.allclose(out2, time_encode_reference(t2, w1, b1, w2, b2),
                        atol=2e-3, rtol=2e-3)

    # multi-tile grid + balanced tiling path (forces >1 grid step)
    t3 = jax.random.uniform(jax.random.PRNGKey(2), (40,), jnp.float32, 0.0, 1000.0)
    out3 = jax.block_until_ready(time_encode_forward(t3, w1, b1, w2, b2, block_bs=16))
    assert out3.shape == (40, channel_time)
    assert jnp.allclose(out3, time_encode_reference(t3, w1, b1, w2, b2),
                        atol=2e-3, rtol=2e-3)

    print("KERNEL_OK")
</pallas_src>

<mosaic_0001>
module attributes {stable_mosaic.version = 11 : i64} {
  func.func @_time_encode_kernel(%arg0: i32, %arg1: memref<8x1xf32, #tpu.memory_space<vmem>>, %arg2: memref<1x8xf32, #tpu.memory_space<vmem>>, %arg3: memref<1x8xf32, #tpu.memory_space<vmem>>, %arg4: memref<8x16xf32, #tpu.memory_space<vmem>>, %arg5: memref<1x16xf32, #tpu.memory_space<vmem>>, %arg6: memref<16x32xf32, #tpu.memory_space<vmem>>, %arg7: memref<1x32xf32, #tpu.memory_space<vmem>>, %arg8: memref<8x32xf32, #tpu.memory_space<vmem>>) attributes {dimension_semantics = [#tpu.dimension_semantics<parallel>], iteration_bounds = array<i64: 1>, scalar_prefetch = 0 : i64, scratch_operands = 0 : i64, tpu.core_type = #tpu.core_type<tc>, window_params = [{transform_indices = @transform_0, window_bounds = array<i64: 8, 1>}, {pipeline_mode = #tpu.pipeline_mode<synchronous>, transform_indices = @transform_1, window_bounds = array<i64: 1, 8>}, {pipeline_mode = #tpu.pipeline_mode<synchronous>, transform_indices = @transform_2, window_bounds = array<i64: 1, 8>}, {pipeline_mode = #tpu.pipeline_mode<synchronous>, transform_indices = @transform_3, window_bounds = array<i64: 8, 16>}, {pipeline_mode = #tpu.pipeline_mode<synchronous>, transform_indices = @transform_4, window_bounds = array<i64: 1, 16>}, {pipeline_mode = #tpu.pipeline_mode<synchronous>, transform_indices = @transform_5, window_bounds = array<i64: 16, 32>}, {pipeline_mode = #tpu.pipeline_mode<synchronous>, transform_indices = @transform_6, window_bounds = array<i64: 1, 32>}, {transform_indices = @transform_7, window_bounds = array<i64: 8, 32>}]} {
    %c0 = arith.constant 0 : index
    %c0_0 = arith.constant 0 : index
    %0 = vector.load %arg1[%c0, %c0_0] : memref<8x1xf32, #tpu.memory_space<vmem>>, vector<8x1xf32>
    %c0_1 = arith.constant 0 : index
    %c0_2 = arith.constant 0 : index
    %1 = vector.load %arg2[%c0_1, %c0_2] : memref<1x8xf32, #tpu.memory_space<vmem>>, vector<1x8xf32>
    %2 = vector.broadcast %0 : vector<8x1xf32> to vector<8x8xf32>
    %3 = vector.broadcast %1 : vector<1x8xf32> to vector<8x8xf32>
    %4 = arith.mulf %2, %3 : vector<8x8xf32>
    %c0_3 = arith.constant 0 : index
    %c0_4 = arith.constant 0 : index
    %5 = vector.load %arg3[%c0_3, %c0_4] : memref<1x8xf32, #tpu.memory_space<vmem>>, vector<1x8xf32>
    %6 = vector.broadcast %5 : vector<1x8xf32> to vector<8x8xf32>
    %7 = arith.addf %4, %6 : vector<8x8xf32>
    %8 = math.sin %7 : vector<8x8xf32>
    %c0_5 = arith.constant 0 : index
    %c0_6 = arith.constant 0 : index
    %9 = vector.load %arg4[%c0_5, %c0_6] : memref<8x16xf32, #tpu.memory_space<vmem>>, vector<8x16xf32>
    %cst = arith.constant dense<0.000000e+00> : vector<8x16xf32>
    %10 = tpu.matmul %8, %9, %cst {dimension_numbers = #tpu.dot_dimension_numbers<[1], [0], [0], [1], [0, 0, 1, 1], [], []>} : vector<8x8xf32>, vector<8x16xf32>, vector<8x16xf32> -> vector<8x16xf32>
    %c0_7 = arith.constant 0 : index
    %c0_8 = arith.constant 0 : index
    %11 = vector.load %arg5[%c0_7, %c0_8] : memref<1x16xf32, #tpu.memory_space<vmem>>, vector<1x16xf32>
    %12 = vector.broadcast %11 : vector<1x16xf32> to vector<8x16xf32>
    %13 = arith.addf %10, %12 : vector<8x16xf32>
    %cst_9 = arith.constant 0.000000e+00 : f32
    %14 = vector.broadcast %cst_9 : f32 to vector<8x16xf32>
    %15 = arith.cmpf oge, %13, %14 : vector<8x16xf32>
    %cst_10 = arith.constant 2.000000e-01 : f32
    %16 = vector.broadcast %cst_10 : f32 to vector<8x16xf32>
    %17 = arith.mulf %16, %13 : vector<8x16xf32>
    %18 = arith.select %15, %13, %17 : vector<8x16xi1>, vector<8x16xf32>
    %c0_11 = arith.constant 0 : index
    %c0_12 = arith.constant 0 : index
    %19 = vector.load %arg6[%c0_11, %c0_12] : memref<16x32xf32, #tpu.memory_space<vmem>>, vector<16x32xf32>
    %cst_13 = arith.constant dense<0.000000e+00> : vector<8x32xf32>
    %20 = tpu.matmul %18, %19, %cst_13 {dimension_numbers = #tpu.dot_dimension_numbers<[1], [0], [0], [1], [0, 0, 1, 1], [], []>} : vector<8x16xf32>, vector<16x32xf32>, vector<8x32xf32> -> vector<8x32xf32>
    %c0_14 = arith.constant 0 : index
    %c0_15 = arith.constant 0 : index
    %21 = vector.load %arg7[%c0_14, %c0_15] : memref<1x32xf32, #tpu.memory_space<vmem>>, vector<1x32xf32>
    %22 = vector.broadcast %21 : vector<1x32xf32> to vector<8x32xf32>
    %23 = arith.addf %20, %22 : vector<8x32xf32>
    %c0_16 = arith.constant 0 : index
    %c0_17 = arith.constant 0 : index
    %24 = vector.load %arg8[%c0_16, %c0_17] : memref<8x32xf32, #tpu.memory_space<vmem>>, vector<8x32xf32>
    tpu.vector_store %arg8[%c0_16, %c0_17], %23 {strides = array<i32>} : memref<8x32xf32, #tpu.memory_space<vmem>>, vector<8x32xf32>,
    return
  }
  func.func @transform_0(%arg0: i32) -> (i32, i32) {
    %c0_i32 = arith.constant 0 : i32
    %c0_i32_0 = arith.constant 0 : i32
    return %arg0, %c0_i32 : i32, i32
  }
  func.func @transform_1(%arg0: i32) -> (i32, i32) {
    %c0_i32 = arith.constant 0 : i32
    %c0_i32_0 = arith.constant 0 : i32
    %c0_i32_1 = arith.constant 0 : i32
    return %c0_i32, %c0_i32_0 : i32, i32
  }
  func.func @transform_2(%arg0: i32) -> (i32, i32) {
    %c0_i32 = arith.constant 0 : i32
    %c0_i32_0 = arith.constant 0 : i32
    %c0_i32_1 = arith.constant 0 : i32
    return %c0_i32, %c0_i32_0 : i32, i32
  }
  func.func @transform_3(%arg0: i32) -> (i32, i32) {
    %c0_i32 = arith.constant 0 : i32
    %c0_i32_0 = arith.constant 0 : i32
    %c0_i32_1 = arith.constant 0 : i32
    return %c0_i32, %c0_i32_0 : i32, i32
  }
  func.func @transform_4(%arg0: i32) -> (i32, i32) {
    %c0_i32 = arith.constant 0 : i32
    %c0_i32_0 = arith.constant 0 : i32
    %c0_i32_1 = arith.constant 0 : i32
    return %c0_i32, %c0_i32_0 : i32, i32
  }
  func.func @transform_5(%arg0: i32) -> (i32, i32) {
    %c0_i32 = arith.constant 0 : i32
    %c0_i32_0 = arith.constant 0 : i32
    %c0_i32_1 = arith.constant 0 : i32
    return %c0_i32, %c0_i32_0 : i32, i32
  }
  func.func @transform_6(%arg0: i32) -> (i32, i32) {
    %c0_i32 = arith.constant 0 : i32
    %c0_i32_0 = arith.constant 0 : i32
    %c0_i32_1 = arith.constant 0 : i32
    return %c0_i32, %c0_i32_0 : i32, i32
  }
  func.func @transform_7(%arg0: i32) -> (i32, i32) {
    %c0_i32 = arith.constant 0 : i32
    %c0_i32_0 = arith.constant 0 : i32
    return %arg0, %c0_i32 : i32, i32
  }
}

module attributes {stable_mosaic.version = 11 : i64} {
  func.func @_time_encode_kernel(%arg0: i32, %arg1: memref<8x1xf32, #tpu.memory_space<vmem>>, %arg2: memref<1x8xf32, #tpu.memory_space<vmem>>, %arg3: memref<1x8xf32, #tpu.memory_space<vmem>>, %arg4: memref<8x16xf32, #tpu.memory_space<vmem>>, %arg5: memref<1x16xf32, #tpu.memory_space<vmem>>, %arg6: memref<16x32xf32, #tpu.memory_space<vmem>>, %arg7: memref<1x32xf32, #tpu.memory_space<vmem>>, %arg8: memref<8x32xf32, #tpu.memory_space<vmem>>) attributes {dimension_semantics = [#tpu.dimension_semantics<parallel>], iteration_bounds = array<i64: 1>, scalar_prefetch = 0 : i64, scratch_operands = 0 : i64, tpu.core_type = #tpu.core_type<tc>, window_params = [{transform_indices = @transform_0, window_bounds = array<i64: 8, 1>}, {pipeline_mode = #tpu.pipeline_mode<synchronous>, transform_indices = @transform_1, window_bounds = array<i64: 1, 8>}, {pipeline_mode = #tpu.pipeline_mode<synchronous>, transform_indices = @transform_2, window_bounds = array<i64: 1, 8>}, {pipeline_mode = #tpu.pipeline_mode<synchronous>, transform_indices = @transform_3, window_bounds = array<i64: 8, 16>}, {pipeline_mode = #tpu.pipeline_mode<synchronous>, transform_indices = @transform_4, window_bounds = array<i64: 1, 16>}, {pipeline_mode = #tpu.pipeline_mode<synchronous>, transform_indices = @transform_5, window_bounds = array<i64: 16, 32>}, {pipeline_mode = #tpu.pipeline_mode<synchronous>, transform_indices = @transform_6, window_bounds = array<i64: 1, 32>}, {transform_indices = @transform_7, window_bounds = array<i64: 8, 32>}]} {
    %c0 = arith.constant 0 : index
    %c0_0 = arith.constant 0 : index
    %0 = vector.load %arg1[%c0, %c0_0] : memref<8x1xf32, #tpu.memory_space<vmem>>, vector<8x1xf32>
    %c0_1 = arith.constant 0 : index
    %c0_2 = arith.constant 0 : index
    %1 = vector.load %arg2[%c0_1, %c0_2] : memref<1x8xf32, #tpu.memory_space<vmem>>, vector<1x8xf32>
    %2 = vector.broadcast %0 : vector<8x1xf32> to vector<8x8xf32>
    %3 = vector.broadcast %1 : vector<1x8xf32> to vector<8x8xf32>
    %4 = arith.mulf %2, %3 : vector<8x8xf32>
    %c0_3 = arith.constant 0 : index
    %c0_4 = arith.constant 0 : index
    %5 = vector.load %arg3[%c0_3, %c0_4] : memref<1x8xf32, #tpu.memory_space<vmem>>, vector<1x8xf32>
    %6 = vector.broadcast %5 : vector<1x8xf32> to vector<8x8xf32>
    %7 = arith.addf %4, %6 : vector<8x8xf32>
    %8 = math.sin %7 : vector<8x8xf32>
    %c0_5 = arith.constant 0 : index
    %c0_6 = arith.constant 0 : index
    %9 = vector.load %arg4[%c0_5, %c0_6] : memref<8x16xf32, #tpu.memory_space<vmem>>, vector<8x16xf32>
    %cst = arith.constant dense<0.000000e+00> : vector<8x16xf32>
    %10 = tpu.matmul %8, %9, %cst {dimension_numbers = #tpu.dot_dimension_numbers<[1], [0], [0], [1], [0, 0, 1, 1], [], []>} : vector<8x8xf32>, vector<8x16xf32>, vector<8x16xf32> -> vector<8x16xf32>
    %c0_7 = arith.constant 0 : index
    %c0_8 = arith.constant 0 : index
    %11 = vector.load %arg5[%c0_7, %c0_8] : memref<1x16xf32, #tpu.memory_space<vmem>>, vector<1x16xf32>
    %12 = vector.broadcast %11 : vector<1x16xf32> to vector<8x16xf32>
    %13 = arith.addf %10, %12 : vector<8x16xf32>
    %cst_9 = arith.constant 0.000000e+00 : f32
    %14 = vector.broadcast %cst_9 : f32 to vector<8x16xf32>
    %15 = arith.cmpf oge, %13, %14 : vector<8x16xf32>
    %cst_10 = arith.constant 2.000000e-01 : f32
    %16 = vector.broadcast %cst_10 : f32 to vector<8x16xf32>
    %17 = arith.mulf %16, %13 : vector<8x16xf32>
    %18 = arith.select %15, %13, %17 : vector<8x16xi1>, vector<8x16xf32>
    %c0_11 = arith.constant 0 : index
    %c0_12 = arith.constant 0 : index
    %19 = vector.load %arg6[%c0_11, %c0_12] : memref<16x32xf32, #tpu.memory_space<vmem>>, vector<16x32xf32>
    %cst_13 = arith.constant dense<0.000000e+00> : vector<8x32xf32>
    %20 = tpu.matmul %18, %19, %cst_13 {dimension_numbers = #tpu.dot_dimension_numbers<[1], [0], [0], [1], [0, 0, 1, 1], [], []>} : vector<8x16xf32>, vector<16x32xf32>, vector<8x32xf32> -> vector<8x32xf32>
    %c0_14 = arith.constant 0 : index
    %c0_15 = arith.constant 0 : index
    %21 = vector.load %arg7[%c0_14, %c0_15] : memref<1x32xf32, #tpu.memory_space<vmem>>, vector<1x32xf32>
    %22 = vector.broadcast %21 : vector<1x32xf32> to vector<8x32xf32>
    %23 = arith.addf %20, %22 : vector<8x32xf32>
    %c0_16 = arith.constant 0 : index
    %c0_17 = arith.constant 0 : index
    %24 = vector.load %arg8[%c0_16, %c0_17] : memref<8x32xf32, #tpu.memory_space<vmem>>, vector<8x32xf32>
    tpu.vector_store %arg8[%c0_16, %c0_17], %23 {strides = array<i32>} : memref<8x32xf32, #tpu.memory_space<vmem>>, vector<8x32xf32>,
    return
  }
  func.func @transform_0(%arg0: i32) -> (i32, i32) {
    %c0_i32 = arith.constant 0 : i32
    %c0_i32_0 = arith.constant 0 : i32
    return %arg0, %c0_i32 : i32, i32
  }
  func.func @transform_1(%arg0: i32) -> (i32, i32) {
    %c0_i32 = arith.constant 0 : i32
    %c0_i32_0 = arith.constant 0 : i32
    %c0_i32_1 = arith.constant 0 : i32
    return %c0_i32, %c0_i32_0 : i32, i32
  }
  func.func @transform_2(%arg0: i32) -> (i32, i32) {
    %c0_i32 = arith.constant 0 : i32
    %c0_i32_0 = arith.constant 0 : i32
    %c0_i32_1 = arith.constant 0 : i32
    return %c0_i32, %c0_i32_0 : i32, i32
  }
  func.func @transform_3(%arg0: i32) -> (i32, i32) {
    %c0_i32 = arith.constant 0 : i32
    %c0_i32_0 = arith.constant 0 : i32
    %c0_i32_1 = arith.constant 0 : i32
    return %c0_i32, %c0_i32_0 : i32, i32
  }
  func.func @transform_4(%arg0: i32) -> (i32, i32) {
    %c0_i32 = arith.constant 0 : i32
    %c0_i32_0 = arith.constant 0 : i32
    %c0_i32_1 = arith.constant 0 : i32
    return %c0_i32, %c0_i32_0 : i32, i32
  }
  func.func @transform_5(%arg0: i32) -> (i32, i32) {
    %c0_i32 = arith.constant 0 : i32
    %c0_i32_0 = arith.constant 0 : i32
    %c0_i32_1 = arith.constant 0 : i32
    return %c0_i32, %c0_i32_0 : i32, i32
  }
  func.func @transform_6(%arg0: i32) -> (i32, i32) {
    %c0_i32 = arith.constant 0 : i32
    %c0_i32_0 = arith.constant 0 : i32
    %c0_i32_1 = arith.constant 0 : i32
    return %c0_i32, %c0_i32_0 : i32, i32
  }
  func.func @transform_7(%arg0: i32) -> (i32, i32) {
    %c0_i32 = arith.constant 0 : i32
    %c0_i32_0 = arith.constant 0 : i32
    return %arg0, %c0_i32 : i32, i32
  }
}

</mosaic_0001>

<bundles_post_ra>
// kernel: tpu_custom_call.1
= control target key start
LH: loop header
LB: loop body
LE: loop exit
PB: predicated region body
PF: predicated region fallthrough
CT: control target
= control target key end

     0   :  { %12 = vsyncpa [#allocation3], 0  ;;  %s582_s0 = inlined_call_operand.vmem [shape: f32[8,1], index: 0, kind: input, shape index: {}]   ;;  %s583_s1 = inlined_call_operand.vmem [shape: f32[1,8], index: 1, kind: input, shape index: {}]   ;;  %s584_s2 = inlined_call_operand.vmem [shape: f32[1,8], index: 2, kind: input, shape index: {}]   ;;  %s585_s3 = inlined_call_operand.hbm [shape: f32[8,16], index: 3, kind: input, shape index: {}]   ;;  %s586_s4 = inlined_call_operand.hbm [shape: f32[1,16], index: 4, kind: input, shape index: {}]   ;;  %s587_s5 = inlined_call_operand.vmem [shape: f32[16,32], index: 5, kind: input, shape index: {}]   ;;  %s588_s6 = inlined_call_operand.vmem [shape: f32[1,32], index: 6, kind: input, shape index: {}]   ;;  %s589_s7 = inlined_call_operand.hbm [shape: f32[8,32], index: 7, kind: output, shape index: {}]  }
   0x1   :  { %13 = vsyncpa [#allocation6], 0 }
   0x2   :  { %14 = vsyncpa [#allocation4], 0  ;;  %s477_s24 = smov [#allocation2]   ;;  %s478_s26 = smov [#allocation5]  }
   0x3   :  { %s27_s25 = sshll.u32 %s477_s24, 4  ;;  %s37_s27 = sshll.u32 %s478_s26, 4  ;;  %s28_s25 = int_to_ptr.vmem [resolvable:$true] %s27_s25  ;;  %s38_s27 = int_to_ptr.vmem [resolvable:$true] %s37_s27 }
   0x4   :  { %s419_s28 = scalar_lea.vmem %s28_s25, 128  ;;  %p424_p1 = scmp.lt.s32.totalorder %s28_s25, %s28_s25 }
   0x5   :  { %p420_p0 = scmp.ne.s32.totalorder %s28_s25, %s419_s28  ;;  %p425_p2 = scmp.lt.s32.totalorder %s419_s28, %s419_s28 }
   0x7   :  { %p426_p3 = por %p425_p2, %p424_p1 }
   0x9   :  { %p427_p4 = pnand %p426_p3, %p420_p0 }
   0xb   :  { %430 = shalt.err (!%p427_p4)
}
   0xc   :  { %30 = dma.hbm_to_vmem [thread:$0]  %s585_s3, 128, %s28_s25, [#allocation3]  }
   0xd   :  { %s439_s8 = scalar_lea.vmem %s38_s27, 16  ;;  %s443_s9 = scalar_lea.vmem %s38_s27, 32 }
   0xe   :  { %p440_p5 = scmp.ne.s32.totalorder %s38_s27, %s439_s8  ;;  %p444_p6 = scmp.lt.s32.totalorder %s38_s27, %s38_s27 }
   0xf   :  { %p445_p7 = scmp.lt.s32.totalorder %s443_s9, %s439_s8 }
  0x11   :  { %p446_p8 = por %p445_p7, %p444_p6 }
  0x13   :  { %p447_p9 = pnand %p446_p8, %p440_p5 }
  0x15   :  { %450 = shalt.err (!%p447_p9)
}
  0x16   :  { %40 = dma.hbm_to_vmem [thread:$0]  %s586_s4, 16, %s38_s27, [#allocation6]  }
  0x17   :  { %471 = dma.done.wait [#allocation3], 128  }
  0x18   :  { %472 = vsyncadd [#allocation3], 4294967168 }
  0x19   :  { %473 = dma.done.wait [#allocation6], 16  }
  0x1a   :  { %474 = vsyncadd [#allocation6], 4294967280  ;;  %v479_v0 = vmov 0   ;;  %v51_v1 = vld [vmem:[%s582_s0] sm:$0xff]  ;;  %v177_v2 = vld [vmem:[#allocation2] sm:$0xff]  ;;  %v480_v3 = vmov 0.0  }
  0x1b   :  { %406 = vset.pattern.permute.xlu0 %v479_v0  ;;  %378 = vmatprep.subr.mxu0 %v480_v3  ;;  %vm481_vm0 = vmmov 0   ;;  %v363_v4 = vld [vmem:[%s583_s1] ss:$0 sm:$0xff]  ;;  %v482_v20 = vmov 2102212464   ;;  %vm185_vm13 = vcmask 64512  }
  0x1c   :  { %55 = vperm.xlu0 %406, %v51_v1   ;;  %380 = vmatprep.mubr.msk.f32.mxu0 %vm481_vm0, %v480_v3  ;;  %v364_v5 = vld [vmem:[%s584_s2] ss:$0 sm:$0xff]  ;;  %v483_v22 = vmov 920167782   ;;  %v484_v26 = vmov 1326507024  }
  0x1d   :  { %379 = vmatpush3.msra.mxu0 %v177_v2  ;;  %383 = vmatprep.subr.mxu1 %v480_v3  ;;  %v485_v28 = vmov 683565275   ;;  %v486_v30 = vmov 2475754826   ;;  %v487_v33 = vmov 2131351028  }
  0x1e   :  { %387 = vmatprep.mubr.msk.f32.mxu1 %vm481_vm0, %v480_v3  ;;  %vm271_vm0 = vcmask 130048   ;;  %s488_s19 = smov [#allocation7]  }
  0x1f   :  { %s353_s20 = sshll.u32 %s488_s19, 4  ;;  %s354_s20 = int_to_ptr.vmem [resolvable:$true] %s353_s20 }
  0x20   :  { %p456_p11 = scmp.lt.s32.totalorder %s354_s20, %s354_s20 }
  0x97   :  { %v56_v6 = vpop.permute.xlu0 %55 }
  0x98   :  { %v64_v7 = vmul.f32 %v363_v4, %v56_v6 }
  0x9a   :  { %v548_v8 = vadd.f32 %v364_v5, %v64_v7 }
  0x9c   :  { %v76_v9 = vand.u32 2139095040, %v548_v8  ;;  %v73_v10 = vand.u32 2147483647, %v548_v8  ;;  %vm75_vm8 = vcmp.lt.s32.totalorder %v548_v8, 0  ;;  %vm165_vm14 = vweird.f32 %v548_v8 }
  0x9e   :  { %v77_v11 = vshrl.u32 %v76_v9, 23  ;;  %v80_v13 = vand.u32 8388607, %v73_v10  ;;  %vm74_vm9 = vcmp.le.f32.partialorder %v73_v10, 0.7853982 }
  0xa0   :  { %v365_v12 = vadd.s32 4294967169, %v77_v11  ;;  %v81_v16 = vor.u32 8388608, %v80_v13 }
  0xa2   :  { %v83_v14 = vadd.s32 1, %v365_v12  ;;  %v121_v24 = vshll.u32 %v81_v16, 8 }
  0xa4   :  { %vm84_vm1 = vcmp.gt.s32.totalorder %v83_v14, 0 }
  0xa5   :  { %v85_v15 = vsel %vm84_vm1, %v83_v14, 0  ;;  %vm345_vm1 = vcmask 261120  }
  0xa6   :  { %v87_v17 = vand.u32 31, %v85_v15  ;;  %v86_v18 = vshrl.u32 %v85_v15, 5 }
  0xa8   :  { %v88_v19 = vsub.s32 32, %v87_v17  ;;  %v99_v21 = vshll.u32 %v482_v20, %v87_v17  ;;  %v102_v23 = vshll.u32 %v483_v22, %v87_v17  ;;  %v90_v29 = vshll.u32 %v485_v28, %v87_v17 }
  0xa9   :  { %v93_v32 = vshll.u32 %v486_v30, %v87_v17  ;;  %v96_v35 = vshll.u32 %v487_v33, %v87_v17  ;;  %vm108_vm2 = vcmp.lt.s32.totalorder %v86_v18, 4  ;;  %vm105_vm3 = vcmp.lt.s32.totalorder %v86_v18, 1 }
  0xaa   :  { %v100_v25 = vshrl.u32 %v483_v22, %v88_v19  ;;  %v103_v27 = vshrl.u32 %v484_v26, %v88_v19  ;;  %v91_v31 = vshrl.u32 %v486_v30, %v88_v19  ;;  %v94_v34 = vshrl.u32 %v487_v33, %v88_v19 }
  0xab   :  { %v97_v36 = vshrl.u32 %v482_v20, %v88_v19  ;;  %v89_v40 = vshrl.u32 %v485_v28, %v88_v19  ;;  %vm106_vm4 = vcmp.lt.s32.totalorder %v86_v18, 2  ;;  %vm107_vm5 = vcmp.lt.s32.totalorder %v86_v18, 3 }
  0xac   :  { %v101_v37 = vor.u32 %v100_v25, %v99_v21  ;;  %v104_v38 = vor.u32 %v103_v27, %v102_v23  ;;  %v92_v39 = vor.u32 %v91_v31, %v90_v29  ;;  %v95_v41 = vor.u32 %v94_v34, %v93_v32 }
  0xad   :  { %v98_v42 = vor.u32 %v97_v36, %v96_v35 }
  0xae   :  { %v114_v43 = vsel %vm108_vm2, %v101_v37, 920167782  ;;  %v118_v44 = vsel %vm108_vm2, %v104_v38, 1326507024  ;;  %v113_v46 = vsel %vm105_vm3, %v92_v39, %v95_v41  ;;  %v109_v49 = vsel %vm105_vm3, %v89_v40, %v92_v39  ;;  %v263_v38 = vld [vmem:[%s587_s5 + $0x8] sm:$0xff]  ;;  %v262_v39 = vld [vmem:[%s587_s5] sm:$0xff] }
  0xaf   :  { %v110_v45 = vsel %vm108_vm2, %v98_v42, 2102212464  ;;  %v115_v47 = vsel %vm107_vm5, %v98_v42, %v114_v43  ;;  %v117_v48 = vsel %vm105_vm3, %v95_v41, %v98_v42  ;;  %v119_v52 = vsel %vm107_vm5, %v101_v37, %v118_v44  ;;  %384 = vmatpush3.msra.mxu1 %v263_v38  ;;  %v369_v40 = vld [vmem:[#allocation5] ss:$0 sm:$0xff]  ;;  %s451_s5 = scalar_lea.vmem %s354_s20, 128 }
  0xb0   :  { %v111_v50 = vsel %vm107_vm5, %v95_v41, %v110_v45  ;;  %v116_v51 = vsel %vm106_vm4, %v113_v46, %v115_v47  ;;  %v120_v53 = vsel %vm106_vm4, %v117_v48, %v119_v52  ;;  %385 = vmatprep.subr.mxu1 %v480_v3  ;;  %v371_v45 = vld [vmem:[%s588_s6] ss:$0 sm:$0xff]  ;;  %p452_p10 = scmp.ne.s32.totalorder %s354_s20, %s451_s5  ;;  %p457_p12 = scmp.lt.s32.totalorder %s451_s5, %s451_s5 }
  0xb1   :  { %v554_v54 = vmul.u32.u64.low %v121_v24, %v116_v51  ;;  %v555_v55 = vmul.u32.u64.high %v121_v24, %v116_v51, %v554_v54  ;;  %v557_v56 = vmul.u32.u64.low %v121_v24, %v120_v53  ;;  %v558_v57 = vmul.u32.u64.high %v121_v24, %v120_v53, %v557_v56  ;;  %386 = vmatpush3.msra.mxu1 %v262_v39 }
  0xb2   :  { %v112_v58 = vsel %vm106_vm4, %v109_v49, %v111_v50  ;;  %p458_p13 = por %p457_p12, %p456_p11 }
  0xb3   :  { %v131_v59 = vadd.s32 1, %v555_v55  ;;  %v128_v60 = vmul.u32 %v121_v24, %v112_v58  ;;  %vm130_vm6 = vc.u32 %v558_v57, %v554_v54  ;;  %v129_v11 = vadd.s32 %v554_v54, %v558_v57 }
  0xb4   :  { %p459_p0 = pnand %p458_p13, %p452_p10 }
  0xb5   :  { %v132_v61 = vsel %vm130_vm6, %v131_v59, %v555_v55 }
  0xb6   :  { %v133_v62 = vadd.s32 %v132_v61, %v128_v60 }
  0xb8   :  { %v134_v63 = vadd.s32 536870912, %v133_v62 }
  0xba   :  { %v135_v0 = vshrl.u32 %v134_v63, 30 }
  0xbc   :  { %v136_v1 = vshll.u32 %v135_v0, 30  ;;  %v159_v24 = vsub.s32 4, %v135_v0 }
  0xbe   :  { %v137_v2 = vsub.s32 %v133_v62, %v136_v1  ;;  %v160_v27 = vsel %vm75_vm8, %v159_v24, %v135_v0 }
  0xbf   :  { %v162_v28 = vsel %vm74_vm9, 0, %v160_v27 }
  0xc0   :  { %v139_v4 = vsub.s32 0, %v137_v2  ;;  %v166_v29 = vadd.s32 3, %v162_v28 }
  0xc2   :  { %v366_v5 = vmin.u32 %v139_v4, %v137_v2  ;;  %v167_v30 = vand.u32 3, %v166_v29 }
  0xc4   :  { %v141_v6 = vclz %v366_v5  ;;  %vm172_vm10 = vcmp.eq.s32.totalorder %v167_v30, 2  ;;  %vm169_vm11 = vcmp.eq.s32.totalorder %v167_v30, 0  ;;  %vm168_vm12 = vcmp.lt.s32.totalorder %v167_v30, 2 }
  0xc6   :  { %v367_v7 = vadd.s32 4294967294, %v141_v6 }
  0xc8   :  { %vm368_vm7 = vcmp.lt.s32.totalorder %v367_v7, 0 }
  0xc9   :  { %v144_v9 = vsel %vm368_vm7, 0, %v367_v7 }
  0xca   :  { %v145_v12 = vsub.s32 32, %v144_v9  ;;  %v149_v13 = vsub.s32 4294967266, %v144_v9  ;;  %v146_v14 = vshll.u32 %v137_v2, %v144_v9 }
  0xcc   :  { %v147_v15 = vshrl.u32 %v129_v11, %v145_v12  ;;  %v150_v16 = vadd.s32 127, %v149_v13 }
  0xce   :  { %v148_v17 = vor.u32 %v147_v15, %v146_v14  ;;  %v151_v18 = vshll.u32 %v150_v16, 23 }
  0xd0   :  { %v152_v19 = vor.u32 4788187, %v151_v18  ;;  %v155_v21 = vcvt.s32.f32 %v148_v17 }
  0xd2   :  { %v153_v20 = vand.u32 2147483647, %v152_v19 }
  0xd4   :  { %v156_v22 = vmul.f32 %v155_v21, %v153_v20 }
  0xd6   :  { %v157_v23 = vxor.u32 2147483648, %v156_v22 }
  0xd8   :  { %v158_v25 = vsel %vm75_vm8, %v157_v23, %v156_v22 }
  0xd9   :  { %v161_v26 = vsel %vm74_vm9, %v548_v8, %v158_v25 }
  0xda   :  { %407 = vcosq.f32 %v161_v26 }
  0xdb   :  { %409 = vsinq.f32 %v161_v26 }
  0xe7   :  { %v408_v31 = vpop.eup %407 }
  0xe8   :  { %v410_v32 = vpop.eup %409  ;;  %v173_v33 = vxor.u32 2147483648, %v408_v31 }
  0xe9   :  { %v170_v34 = vxor.u32 2147483648, %v410_v32 }
  0xea   :  { %v174_v35 = vsel %vm172_vm10, %v173_v33, %v410_v32 }
  0xeb   :  { %v171_v36 = vsel %vm169_vm11, %v408_v31, %v170_v34 }
  0xec   :  { %v175_v10 = vsel %vm168_vm12, %v171_v36, %v174_v35 }
  0xed   :  { %v176_v37 = vsel %vm165_vm14, nan, %v175_v10 }
  0xee   :  { %381 = vmatmul.mubr.msk.f32.vlgmr.msra.gmra.mxu0 %vm185_vm13, %v176_v37 }
 0x1ae   :  { %v255_v41 = vpop.f32.mrf.mxu0 }
 0x1af   :  { %v256_v42 = vadd.f32 %v369_v40, %v255_v41 }
 0x1b0   :  { %v382_v43 = vpop.f32.mrf.mxu0 }
 0x1b1   :  { %vm259_vm15 = vcmp.ge.f32.partialorder %v256_v42, 0.0  ;;  %v260_v8 = vmul.f32 0.2, %v256_v42 }
 0x1b3   :  { %v261_v44 = vsel %vm259_vm15, %v256_v42, %v260_v8 }
 0x1b4   :  { %388 = vmatmul.mubr.msk.f32.vlgmr.msra.gmra.mxu1 %vm271_vm0, %v261_v44 }
 0x274   :  { %v341_v46 = vpop.f32.mrf.mxu1 }
 0x275   :  { %v342_v47 = vadd.f32 %v371_v45, %v341_v46 }
 0x276   :  { %v389_v3 = vpop.f32.mrf.mxu1 }
 0x277   :  { %346 = vst.msk [vmem:[#allocation7] sm:$0xff] %vm345_vm1, %v342_v47 }
 0x278   :  { %462 = shalt.err (!%p459_p0)
}
 0x279   :  { %356 = dma.vmem_to_hbm [thread:$0]  %s354_s20, 128, %s589_s7, [#allocation4]  }
 0x27a   :  { %475 = dma.done.wait [#allocation4], 128  }
 0x27b   :  { %476 = vsyncadd [#allocation4], 4294967168 }
 0x27c   :  { %360 = vsyncpa [#allocation3], 1 }
 0x27d   :  { %361 = vsyncpa [#allocation6], 1 }
 0x27e   :  { %362 = vsyncpa [#allocation4], 1 }

// kernel: tpu_custom_call.1
= control target key start
LH: loop header
LB: loop body
LE: loop exit
PB: predicated region body
PF: predicated region fallthrough
CT: control target
= control target key end

     0   :  { %12 = vsyncpa [#allocation3], 0  ;;  %s582_s0 = inlined_call_operand.vmem [shape: f32[8,1], index: 0, kind: input, shape index: {}]   ;;  %s583_s1 = inlined_call_operand.vmem [shape: f32[1,8], index: 1, kind: input, shape index: {}]   ;;  %s584_s2 = inlined_call_operand.vmem [shape: f32[1,8], index: 2, kind: input, shape index: {}]   ;;  %s585_s3 = inlined_call_operand.hbm [shape: f32[8,16], index: 3, kind: input, shape index: {}]   ;;  %s586_s4 = inlined_call_operand.hbm [shape: f32[1,16], index: 4, kind: input, shape index: {}]   ;;  %s587_s5 = inlined_call_operand.vmem [shape: f32[16,32], index: 5, kind: input, shape index: {}]   ;;  %s588_s6 = inlined_call_operand.vmem [shape: f32[1,32], index: 6, kind: input, shape index: {}]   ;;  %s589_s7 = inlined_call_operand.hbm [shape: f32[8,32], index: 7, kind: output, shape index: {}]  }
   0x1   :  { %13 = vsyncpa [#allocation6], 0 }
   0x2   :  { %14 = vsyncpa [#allocation4], 0  ;;  %s477_s24 = smov [#allocation2]   ;;  %s478_s26 = smov [#allocation5]  }
   0x3   :  { %s27_s25 = sshll.u32 %s477_s24, 4  ;;  %s37_s27 = sshll.u32 %s478_s26, 4  ;;  %s28_s25 = int_to_ptr.vmem [resolvable:$true] %s27_s25  ;;  %s38_s27 = int_to_ptr.vmem [resolvable:$true] %s37_s27 }
   0x4   :  { %s419_s28 = scalar_lea.vmem %s28_s25, 128  ;;  %p424_p1 = scmp.lt.s32.totalorder %s28_s25, %s28_s25 }
   0x5   :  { %p420_p0 = scmp.ne.s32.totalorder %s28_s25, %s419_s28  ;;  %p425_p2 = scmp.lt.s32.totalorder %s419_s28, %s419_s28 }
   0x7   :  { %p426_p3 = por %p425_p2, %p424_p1 }
   0x9   :  { %p427_p4 = pnand %p426_p3, %p420_p0 }
   0xb   :  { %430 = shalt.err (!%p427_p4)
}
   0xc   :  { %30 = dma.hbm_to_vmem [thread:$0]  %s585_s3, 128, %s28_s25, [#allocation3]  }
   0xd   :  { %s439_s8 = scalar_lea.vmem %s38_s27, 16  ;;  %s443_s9 = scalar_lea.vmem %s38_s27, 32 }
   0xe   :  { %p440_p5 = scmp.ne.s32.totalorder %s38_s27, %s439_s8  ;;  %p444_p6 = scmp.lt.s32.totalorder %s38_s27, %s38_s27 }
   0xf   :  { %p445_p7 = scmp.lt.s32.totalorder %s443_s9, %s439_s8 }
  0x11   :  { %p446_p8 = por %p445_p7, %p444_p6 }
  0x13   :  { %p447_p9 = pnand %p446_p8, %p440_p5 }
  0x15   :  { %450 = shalt.err (!%p447_p9)
}
  0x16   :  { %40 = dma.hbm_to_vmem [thread:$0]  %s586_s4, 16, %s38_s27, [#allocation6]  }
  0x17   :  { %471 = dma.done.wait [#allocation3], 128  }
  0x18   :  { %472 = vsyncadd [#allocation3], 4294967168 }
  0x19   :  { %473 = dma.done.wait [#allocation6], 16  }
  0x1a   :  { %474 = vsyncadd [#allocation6], 4294967280  ;;  %v479_v0 = vmov 0   ;;  %v51_v1 = vld [vmem:[%s582_s0] sm:$0xff]  ;;  %v177_v2 = vld [vmem:[#allocation2] sm:$0xff]  ;;  %v480_v3 = vmov 0.0  }
  0x1b   :  { %406 = vset.pattern.permute.xlu0 %v479_v0  ;;  %378 = vmatprep.subr.mxu0 %v480_v3  ;;  %vm481_vm0 = vmmov 0   ;;  %v363_v4 = vld [vmem:[%s583_s1] ss:$0 sm:$0xff]  ;;  %v482_v20 = vmov 2102212464   ;;  %vm185_vm13 = vcmask 64512  }
  0x1c   :  { %55 = vperm.xlu0 %406, %v51_v1   ;;  %380 = vmatprep.mubr.msk.f32.mxu0 %vm481_vm0, %v480_v3  ;;  %v364_v5 = vld [vmem:[%s584_s2] ss:$0 sm:$0xff]  ;;  %v483_v22 = vmov 920167782   ;;  %v484_v26 = vmov 1326507024  }
  0x1d   :  { %379 = vmatpush3.msra.mxu0 %v177_v2  ;;  %383 = vmatprep.subr.mxu1 %v480_v3  ;;  %v485_v28 = vmov 683565275   ;;  %v486_v30 = vmov 2475754826   ;;  %v487_v33 = vmov 2131351028  }
  0x1e   :  { %387 = vmatprep.mubr.msk.f32.mxu1 %vm481_vm0, %v480_v3  ;;  %vm271_vm0 = vcmask 130048   ;;  %s488_s19 = smov [#allocation7]  }
  0x1f   :  { %s353_s20 = sshll.u32 %s488_s19, 4  ;;  %s354_s20 = int_to_ptr.vmem [resolvable:$true] %s353_s20 }
  0x20   :  { %p456_p11 = scmp.lt.s32.totalorder %s354_s20, %s354_s20 }
  0x97   :  { %v56_v6 = vpop.permute.xlu0 %55 }
  0x98   :  { %v64_v7 = vmul.f32 %v363_v4, %v56_v6 }
  0x9a   :  { %v548_v8 = vadd.f32 %v364_v5, %v64_v7 }
  0x9c   :  { %v76_v9 = vand.u32 2139095040, %v548_v8  ;;  %v73_v10 = vand.u32 2147483647, %v548_v8  ;;  %vm75_vm8 = vcmp.lt.s32.totalorder %v548_v8, 0  ;;  %vm165_vm14 = vweird.f32 %v548_v8 }
  0x9e   :  { %v77_v11 = vshrl.u32 %v76_v9, 23  ;;  %v80_v13 = vand.u32 8388607, %v73_v10  ;;  %vm74_vm9 = vcmp.le.f32.partialorder %v73_v10, 0.7853982 }
  0xa0   :  { %v365_v12 = vadd.s32 4294967169, %v77_v11  ;;  %v81_v16 = vor.u32 8388608, %v80_v13 }
  0xa2   :  { %v83_v14 = vadd.s32 1, %v365_v12  ;;  %v121_v24 = vshll.u32 %v81_v16, 8 }
  0xa4   :  { %vm84_vm1 = vcmp.gt.s32.totalorder %v83_v14, 0 }
  0xa5   :  { %v85_v15 = vsel %vm84_vm1, %v83_v14, 0  ;;  %vm345_vm1 = vcmask 261120  }
  0xa6   :  { %v87_v17 = vand.u32 31, %v85_v15  ;;  %v86_v18 = vshrl.u32 %v85_v15, 5 }
  0xa8   :  { %v88_v19 = vsub.s32 32, %v87_v17  ;;  %v99_v21 = vshll.u32 %v482_v20, %v87_v17  ;;  %v102_v23 = vshll.u32 %v483_v22, %v87_v17  ;;  %v90_v29 = vshll.u32 %v485_v28, %v87_v17 }
  0xa9   :  { %v93_v32 = vshll.u32 %v486_v30, %v87_v17  ;;  %v96_v35 = vshll.u32 %v487_v33, %v87_v17  ;;  %vm108_vm2 = vcmp.lt.s32.totalorder %v86_v18, 4  ;;  %vm105_vm3 = vcmp.lt.s32.totalorder %v86_v18, 1 }
  0xaa   :  { %v100_v25 = vshrl.u32 %v483_v22, %v88_v19  ;;  %v103_v27 = vshrl.u32 %v484_v26, %v88_v19  ;;  %v91_v31 = vshrl.u32 %v486_v30, %v88_v19  ;;  %v94_v34 = vshrl.u32 %v487_v33, %v88_v19 }
  0xab   :  { %v97_v36 = vshrl.u32 %v482_v20, %v88_v19  ;;  %v89_v40 = vshrl.u32 %v485_v28, %v88_v19  ;;  %vm106_vm4 = vcmp.lt.s32.totalorder %v86_v18, 2  ;;  %vm107_vm5 = vcmp.lt.s32.totalorder %v86_v18, 3 }
  0xac   :  { %v101_v37 = vor.u32 %v100_v25, %v99_v21  ;;  %v104_v38 = vor.u32 %v103_v27, %v102_v23  ;;  %v92_v39 = vor.u32 %v91_v31, %v90_v29  ;;  %v95_v41 = vor.u32 %v94_v34, %v93_v32 }
  0xad   :  { %v98_v42 = vor.u32 %v97_v36, %v96_v35 }
  0xae   :  { %v114_v43 = vsel %vm108_vm2, %v101_v37, 920167782  ;;  %v118_v44 = vsel %vm108_vm2, %v104_v38, 1326507024  ;;  %v113_v46 = vsel %vm105_vm3, %v92_v39, %v95_v41  ;;  %v109_v49 = vsel %vm105_vm3, %v89_v40, %v92_v39  ;;  %v263_v38 = vld [vmem:[%s587_s5 + $0x8] sm:$0xff]  ;;  %v262_v39 = vld [vmem:[%s587_s5] sm:$0xff] }
  0xaf   :  { %v110_v45 = vsel %vm108_vm2, %v98_v42, 2102212464  ;;  %v115_v47 = vsel %vm107_vm5, %v98_v42, %v114_v43  ;;  %v117_v48 = vsel %vm105_vm3, %v95_v41, %v98_v42  ;;  %v119_v52 = vsel %vm107_vm5, %v101_v37, %v118_v44  ;;  %384 = vmatpush3.msra.mxu1 %v263_v38  ;;  %v369_v40 = vld [vmem:[#allocation5] ss:$0 sm:$0xff]  ;;  %s451_s5 = scalar_lea.vmem %s354_s20, 128 }
  0xb0   :  { %v111_v50 = vsel %vm107_vm5, %v95_v41, %v110_v45  ;;  %v116_v51 = vsel %vm106_vm4, %v113_v46, %v115_v47  ;;  %v120_v53 = vsel %vm106_vm4, %v117_v48, %v119_v52  ;;  %385 = vmatprep.subr.mxu1 %v480_v3  ;;  %v371_v45 = vld [vmem:[%s588_s6] ss:$0 sm:$0xff]  ;;  %p452_p10 = scmp.ne.s32.totalorder %s354_s20, %s451_s5  ;;  %p457_p12 = scmp.lt.s32.totalorder %s451_s5, %s451_s5 }
  0xb1   :  { %v554_v54 = vmul.u32.u64.low %v121_v24, %v116_v51  ;;  %v555_v55 = vmul.u32.u64.high %v121_v24, %v116_v51, %v554_v54  ;;  %v557_v56 = vmul.u32.u64.low %v121_v24, %v120_v53  ;;  %v558_v57 = vmul.u32.u64.high %v121_v24, %v120_v53, %v557_v56  ;;  %386 = vmatpush3.msra.mxu1 %v262_v39 }
  0xb2   :  { %v112_v58 = vsel %vm106_vm4, %v109_v49, %v111_v50  ;;  %p458_p13 = por %p457_p12, %p456_p11 }
  0xb3   :  { %v131_v59 = vadd.s32 1, %v555_v55  ;;  %v128_v60 = vmul.u32 %v121_v24, %v112_v58  ;;  %vm130_vm6 = vc.u32 %v558_v57, %v554_v54  ;;  %v129_v11 = vadd.s32 %v554_v54, %v558_v57 }
  0xb4   :  { %p459_p0 = pnand %p458_p13, %p452_p10 }
  0xb5   :  { %v132_v61 = vsel %vm130_vm6, %v131_v59, %v555_v55 }
  0xb6   :  { %v133_v62 = vadd.s32 %v132_v61, %v128_v60 }
  0xb8   :  { %v134_v63 = vadd.s32 536870912, %v133_v62 }
  0xba   :  { %v135_v0 = vshrl.u32 %v134_v63, 30 }
  0xbc   :  { %v136_v1 = vshll.u32 %v135_v0, 30  ;;  %v159_v24 = vsub.s32 4, %v135_v0 }
  0xbe   :  { %v137_v2 = vsub.s32 %v133_v62, %v136_v1  ;;  %v160_v27 = vsel %vm75_vm8, %v159_v24, %v135_v0 }
  0xbf   :  { %v162_v28 = vsel %vm74_vm9, 0, %v160_v27 }
  0xc0   :  { %v139_v4 = vsub.s32 0, %v137_v2  ;;  %v166_v29 = vadd.s32 3, %v162_v28 }
  0xc2   :  { %v366_v5 = vmin.u32 %v139_v4, %v137_v2  ;;  %v167_v30 = vand.u32 3, %v166_v29 }
  0xc4   :  { %v141_v6 = vclz %v366_v5  ;;  %vm172_vm10 = vcmp.eq.s32.totalorder %v167_v30, 2  ;;  %vm169_vm11 = vcmp.eq.s32.totalorder %v167_v30, 0  ;;  %vm168_vm12 = vcmp.lt.s32.totalorder %v167_v30, 2 }
  0xc6   :  { %v367_v7 = vadd.s32 4294967294, %v141_v6 }
  0xc8   :  { %vm368_vm7 = vcmp.lt.s32.totalorder %v367_v7, 0 }
  0xc9   :  { %v144_v9 = vsel %vm368_vm7, 0, %v367_v7 }
  0xca   :  { %v145_v12 = vsub.s32 32, %v144_v9  ;;  %v149_v13 = vsub.s32 4294967266, %v144_v9  ;;  %v146_v14 = vshll.u32 %v137_v2, %v144_v9 }
  0xcc   :  { %v147_v15 = vshrl.u32 %v129_v11, %v145_v12  ;;  %v150_v16 = vadd.s32 127, %v149_v13 }
  0xce   :  { %v148_v17 = vor.u32 %v147_v15, %v146_v14  ;;  %v151_v18 = vshll.u32 %v150_v16, 23 }
  0xd0   :  { %v152_v19 = vor.u32 4788187, %v151_v18  ;;  %v155_v21 = vcvt.s32.f32 %v148_v17 }
  0xd2   :  { %v153_v20 = vand.u32 2147483647, %v152_v19 }
  0xd4   :  { %v156_v22 = vmul.f32 %v155_v21, %v153_v20 }
  0xd6   :  { %v157_v23 = vxor.u32 2147483648, %v156_v22 }
  0xd8   :  { %v158_v25 = vsel %vm75_vm8, %v157_v23, %v156_v22 }
  0xd9   :  { %v161_v26 = vsel %vm74_vm9, %v548_v8, %v158_v25 }
  0xda   :  { %407 = vcosq.f32 %v161_v26 }
  0xdb   :  { %409 = vsinq.f32 %v161_v26 }
  0xe7   :  { %v408_v31 = vpop.eup %407 }
  0xe8   :  { %v410_v32 = vpop.eup %409  ;;  %v173_v33 = vxor.u32 2147483648, %v408_v31 }
  0xe9   :  { %v170_v34 = vxor.u32 2147483648, %v410_v32 }
  0xea   :  { %v174_v35 = vsel %vm172_vm10, %v173_v33, %v410_v32 }
  0xeb   :  { %v171_v36 = vsel %vm169_vm11, %v408_v31, %v170_v34 }
  0xec   :  { %v175_v10 = vsel %vm168_vm12, %v171_v36, %v174_v35 }
  0xed   :  { %v176_v37 = vsel %vm165_vm14, nan, %v175_v10 }
  0xee   :  { %381 = vmatmul.mubr.msk.f32.vlgmr.msra.gmra.mxu0 %vm185_vm13, %v176_v37 }
 0x1ae   :  { %v255_v41 = vpop.f32.mrf.mxu0 }
 0x1af   :  { %v256_v42 = vadd.f32 %v369_v40, %v255_v41 }
 0x1b0   :  { %v382_v43 = vpop.f32.mrf.mxu0 }
 0x1b1   :  { %vm259_vm15 = vcmp.ge.f32.partialorder %v256_v42, 0.0  ;;  %v260_v8 = vmul.f32 0.2, %v256_v42 }
 0x1b3   :  { %v261_v44 = vsel %vm259_vm15, %v256_v42, %v260_v8 }
 0x1b4   :  { %388 = vmatmul.mubr.msk.f32.vlgmr.msra.gmra.mxu1 %vm271_vm0, %v261_v44 }
 0x274   :  { %v341_v46 = vpop.f32.mrf.mxu1 }
 0x275   :  { %v342_v47 = vadd.f32 %v371_v45, %v341_v46 }
 0x276   :  { %v389_v3 = vpop.f32.mrf.mxu1 }
 0x277   :  { %346 = vst.msk [vmem:[#allocation7] sm:$0xff] %vm345_vm1, %v342_v47 }
 0x278   :  { %462 = shalt.err (!%p459_p0)
}
 0x279   :  { %356 = dma.vmem_to_hbm [thread:$0]  %s354_s20, 128, %s589_s7, [#allocation4]  }
 0x27a   :  { %475 = dma.done.wait [#allocation4], 128  }
 0x27b   :  { %476 = vsyncadd [#allocation4], 4294967168 }
 0x27c   :  { %360 = vsyncpa [#allocation3], 1 }
 0x27d   :  { %361 = vsyncpa [#allocation6], 1 }
 0x27e   :  { %362 = vsyncpa [#allocation4], 1 }

</bundles_post_ra>
